<compile_context>
chip_gen: v7x
topology: tpu7x:2x2x1
jax: 0.10.0
libtpu: 0.0.40
codegen_flags: <defaults>
</compile_context>

<pallas_src>
import jax
import jax.numpy as jnp
from jax import lax
from jax.experimental import pallas as pl
from jax.experimental.pallas import tpu as pltpu


def _round_up(x: int, m: int) -> int:
    return ((x + m - 1) // m) * m


def _pad2(a, rows: int, cols: int):
    pr = rows - a.shape[0]
    pc = cols - a.shape[1]
    if pr == 0 and pc == 0:
        return a
    return jnp.pad(a, ((0, pr), (0, pc)))


def _cosine_linear_kernel(x_ref, xs_ref, w_ref, winv_ref, o_ref, acc_ref):
    # x_ref:    (TM, TK)  input tile
    # xs_ref:   (TM, 1)   sigma / max(||x_row||, eps)   (precomputed in wrapper)
    # w_ref:    (TN, TK)  weight tile
    # winv_ref: (TN, 1)   1 / max(||w_row||, eps)       (precomputed in wrapper)
    # o_ref:    (TM, TN)  output tile (resident across the k axis)
    # acc_ref:  (TM, TN)  f32 accumulator scratch
    k = pl.program_id(2)

    @pl.when(k == 0)
    def _():
        acc_ref[...] = jnp.zeros_like(acc_ref)

    # Cheap (row,1) broadcast scales; sigma already folded into xs.
    xn = x_ref[...].astype(jnp.float32) * xs_ref[...]          # (TM, TK)
    wn = w_ref[...].astype(jnp.float32) * winv_ref[...]        # (TN, TK)

    # MXU matmul contracting the last (lane) dim of both operands (no transpose).
    acc_ref[...] += lax.dot_general(
        xn, wn,
        dimension_numbers=(((1,), (1,)), ((), ())),
        preferred_element_type=jnp.float32,
    )                                                          # (TM, TN)

    @pl.when(k == pl.num_programs(2) - 1)
    def _():
        o_ref[...] = acc_ref[...].astype(o_ref.dtype)


def cosine_linear(x, weight, sigma):
    """x: (B, D) f32, weight: (C, D) f32, sigma: (1,) f32 -> (B, C) f32."""
    B, D = x.shape
    C, D2 = weight.shape
    assert D == D2

    eps = jnp.float32(1e-12)
    x_f32 = x.astype(jnp.float32)
    w_f32 = weight.astype(jnp.float32)

    # Inverse row norms precomputed ONCE (hoisted out of the C-tile loop).
    # rsqrt(max(sumsq, eps^2)) == 1/max(norm, eps); eps^2 = 1e-24 is a normal f32.
    x_sumsq = jnp.sum(x_f32 * x_f32, axis=1, keepdims=True)            # (B, 1)
    w_sumsq = jnp.sum(w_f32 * w_f32, axis=1, keepdims=True)            # (C, 1)
    x_inv = lax.rsqrt(jnp.maximum(x_sumsq, eps * eps))
    w_inv = lax.rsqrt(jnp.maximum(w_sumsq, eps * eps))
    x_scale = x_inv * sigma.astype(jnp.float32)[0]                     # fold sigma

    # ---- tile selection ----
    TN = min(512, _round_up(C, 128))      # lane-dense output / weight-row tile
    TM = min(512, _round_up(B, 8))        # sublane-aligned batch tile
    Bp = _round_up(B, TM)
    Cp = _round_up(C, TN)
    # v7x megacore: keep >= 2 parallel blocks when the problem allows it.
    if (Bp // TM) * (Cp // TN) < 2 and B >= 16:
        TM = _round_up((B + 1) // 2, 8)
        Bp = _round_up(B, TM)

    Dp = _round_up(D, 128)
    TK = min(2048, Dp)                    # K tile (reduction axis)
    Kp = _round_up(Dp, TK)

    # Zero padding is semantics-preserving: padded rows/cols carry zero scales
    # and zero features, producing zeros that are sliced off; padded feature
    # columns don't change the dot products.  Pads are skipped when aligned.
    xp = _pad2(x_f32, Bp, Kp)
    wp = _pad2(w_f32, Cp, Kp)
    xsp = _pad2(x_scale, Bp, 1)
    wip = _pad2(w_inv, Cp, 1)

    grid = (Bp // TM, Cp // TN, Kp // TK)

    # VMEM budget: double-buffered inputs + output + accumulator, with headroom,
    # capped below v7x's 64 MiB physical VMEM per TensorCore.
    f32b = 4
    tile_bytes = (
        2 * (TM * TK + TN * TK + TM + TN) * f32b   # double-buffered input blocks
        + 2 * TM * TN * f32b                       # output block (double-buffered)
        + TM * TN * f32b                           # accumulator scratch
    )
    vmem_limit = min(48 * 1024 * 1024,
                     max(32 * 1024 * 1024, int(tile_bytes * 1.25) + (4 << 20)))

    # Note: if a profile on v5e shows exposed W DMA, add
    # pipeline_mode=pl.Buffered(3) on the weight BlockSpec.
    out = pl.pallas_call(
        _cosine_linear_kernel,
        out_shape=jax.ShapeDtypeStruct((Bp, Cp), x.dtype),
        grid_spec=pltpu.PrefetchScalarGridSpec(
            num_scalar_prefetch=0,
            grid=grid,
            in_specs=[
                pl.BlockSpec((TM, TK), lambda i, j, k: (i, k)),   # x tile
                pl.BlockSpec((TM, 1), lambda i, j, k: (i, 0)),    # sigma/||x||
                pl.BlockSpec((TN, TK), lambda i, j, k: (j, k)),   # weight tile
                pl.BlockSpec((TN, 1), lambda i, j, k: (j, 0)),    # 1/||w||
            ],
            out_specs=pl.BlockSpec((TM, TN), lambda i, j, k: (i, j)),
            scratch_shapes=[pltpu.VMEM((TM, TN), jnp.float32)],
        ),
        compiler_params=pltpu.CompilerParams(
            dimension_semantics=("parallel", "parallel", "arbitrary"),
            vmem_limit_bytes=vmem_limit,
        ),
    )(xp, xsp, wp, wip)

    return out[:B, :C]


def reference(x, weight, sigma):
    eps = 1e-12
    xn = x / jnp.maximum(jnp.linalg.norm(x, axis=1, keepdims=True), eps)
    wn = weight / jnp.maximum(jnp.linalg.norm(weight, axis=1, keepdims=True), eps)
    return sigma[0] * (xn @ wn.T)


if __name__ == "__main__":
    in_features = 32
    out_features = 16
    batch = 8

    key = jax.random.PRNGKey(0)
    kx, kw = jax.random.split(key)

    # Deterministic init mirroring reset_parameters():
    #   weight ~ U(-stdv, stdv), stdv = 1/sqrt(in_features); sigma = 1.0
    stdv = 1.0 / (in_features ** 0.5)
    weight = jax.random.uniform(
        kw, (out_features, in_features), jnp.float32, minval=-stdv, maxval=stdv
    )
    sigma = jnp.ones((1,), jnp.float32)

    x = jax.random.normal(kx, (batch, in_features), jnp.float32)

    out = cosine_linear(x, weight, sigma)
    out = jax.block_until_ready(out)

    ref = reference(x, weight, sigma)
    assert out.shape == (batch, out_features)
    assert jnp.allclose(out, ref, atol=1e-5, rtol=1e-5), (
        f"max abs err = {jnp.max(jnp.abs(out - ref))}"
    )
    print("KERNEL_OK")
</pallas_src>

<mosaic_0001>
module attributes {stable_mosaic.version = 11 : i64} {
  func.func @_cosine_linear_kernel(%arg0: i32, %arg1: i32, %arg2: i32, %arg3: memref<8x128xf32, #tpu.memory_space<vmem>>, %arg4: memref<8x1xf32, #tpu.memory_space<vmem>>, %arg5: memref<128x128xf32, #tpu.memory_space<vmem>>, %arg6: memref<128x1xf32, #tpu.memory_space<vmem>>, %arg7: memref<8x128xf32, #tpu.memory_space<vmem>>, %arg8: memref<8x128xf32, #tpu.memory_space<vmem>>) attributes {dimension_semantics = [#tpu.dimension_semantics<parallel>, #tpu.dimension_semantics<parallel>, #tpu.dimension_semantics<arbitrary>], iteration_bounds = array<i64: 1, 1, 1>, scalar_prefetch = 0 : i64, scratch_operands = 1 : i64, tpu.core_type = #tpu.core_type<tc>, window_params = [{transform_indices = @transform_0, window_bounds = array<i64: 8, 128>}, {transform_indices = @transform_1, window_bounds = array<i64: 8, 1>}, {transform_indices = @transform_2, window_bounds = array<i64: 128, 128>}, {transform_indices = @transform_3, window_bounds = array<i64: 128, 1>}, {transform_indices = @transform_4, window_bounds = array<i64: 8, 128>}]} {
    %c0_i32 = arith.constant 0 : i32
    %0 = arith.cmpi eq, %arg2, %c0_i32 : i32
    %1 = arith.extui %0 : i1 to i32
    %c0_i32_0 = arith.constant 0 : i32
    %2 = arith.cmpi ne, %1, %c0_i32_0 : i32
    scf.if %2 {
      %cst_14 = arith.constant 0.000000e+00 : f32
      %18 = vector.broadcast %cst_14 : f32 to vector<8x128xf32>
      %c0_15 = arith.constant 0 : index
      %c0_16 = arith.constant 0 : index
      %19 = vector.load %arg8[%c0_15, %c0_16] : memref<8x128xf32, #tpu.memory_space<vmem>>, vector<8x128xf32>
      tpu.vector_store %arg8[%c0_15, %c0_16], %18 {strides = array<i32>} : memref<8x128xf32, #tpu.memory_space<vmem>>, vector<8x128xf32>,
    } else {
    }
    %c0 = arith.constant 0 : index
    %c0_1 = arith.constant 0 : index
    %3 = vector.load %arg3[%c0, %c0_1] : memref<8x128xf32, #tpu.memory_space<vmem>>, vector<8x128xf32>
    %c0_2 = arith.constant 0 : index
    %c0_3 = arith.constant 0 : index
    %4 = vector.load %arg4[%c0_2, %c0_3] : memref<8x1xf32, #tpu.memory_space<vmem>>, vector<8x1xf32>
    %5 = vector.broadcast %4 : vector<8x1xf32> to vector<8x128xf32>
    %6 = arith.mulf %3, %5 : vector<8x128xf32>
    %c0_4 = arith.constant 0 : index
    %c0_5 = arith.constant 0 : index
    %7 = vector.load %arg5[%c0_4, %c0_5] : memref<128x128xf32, #tpu.memory_space<vmem>>, vector<128x128xf32>
    %c0_6 = arith.constant 0 : index
    %c0_7 = arith.constant 0 : index
    %8 = vector.load %arg6[%c0_6, %c0_7] : memref<128x1xf32, #tpu.memory_space<vmem>>, vector<128x1xf32>
    %9 = vector.broadcast %8 : vector<128x1xf32> to vector<128x128xf32>
    %10 = arith.mulf %7, %9 : vector<128x128xf32>
    %c0_8 = arith.constant 0 : index
    %c0_9 = arith.constant 0 : index
    %11 = vector.load %arg8[%c0_8, %c0_9] : memref<8x128xf32, #tpu.memory_space<vmem>>, vector<8x128xf32>
    %cst = arith.constant dense<0.000000e+00> : vector<8x128xf32>
    %12 = tpu.matmul %6, %10, %cst {dimension_numbers = #tpu.dot_dimension_numbers<[1], [1], [0], [0], [0, 0, 1, 0], [], []>} : vector<8x128xf32>, vector<128x128xf32>, vector<8x128xf32> -> vector<8x128xf32>
    %13 = arith.addf %11, %12 : vector<8x128xf32>
    %c0_10 = arith.constant 0 : index
    %c0_11 = arith.constant 0 : index
    %14 = vector.load %arg8[%c0_10, %c0_11] : memref<8x128xf32, #tpu.memory_space<vmem>>, vector<8x128xf32>
    tpu.vector_store %arg8[%c0_10, %c0_11], %13 {strides = array<i32>} : memref<8x128xf32, #tpu.memory_space<vmem>>, vector<8x128xf32>,
    %c0_i32_12 = arith.constant 0 : i32
    %15 = arith.cmpi eq, %arg2, %c0_i32_12 : i32
    %16 = arith.extui %15 : i1 to i32
    %c0_i32_13 = arith.constant 0 : i32
    %17 = arith.cmpi ne, %16, %c0_i32_13 : i32
    scf.if %17 {
      %c0_14 = arith.constant 0 : index
      %c0_15 = arith.constant 0 : index
      %18 = vector.load %arg8[%c0_14, %c0_15] : memref<8x128xf32, #tpu.memory_space<vmem>>, vector<8x128xf32>
      %c0_16 = arith.constant 0 : index
      %c0_17 = arith.constant 0 : index
      %19 = vector.load %arg7[%c0_16, %c0_17] : memref<8x128xf32, #tpu.memory_space<vmem>>, vector<8x128xf32>
      tpu.vector_store %arg7[%c0_16, %c0_17], %18 {strides = array<i32>} : memref<8x128xf32, #tpu.memory_space<vmem>>, vector<8x128xf32>,
    } else {
    }
    return
  }
  func.func @transform_0(%arg0: i32, %arg1: i32, %arg2: i32) -> (i32, i32) {
    %c0_i32 = arith.constant 0 : i32
    return %arg0, %arg2 : i32, i32
  }
  func.func @transform_1(%arg0: i32, %arg1: i32, %arg2: i32) -> (i32, i32) {
    %c0_i32 = arith.constant 0 : i32
    %c0_i32_0 = arith.constant 0 : i32
    return %arg0, %c0_i32 : i32, i32
  }
  func.func @transform_2(%arg0: i32, %arg1: i32, %arg2: i32) -> (i32, i32) {
    %c0_i32 = arith.constant 0 : i32
    return %arg1, %arg2 : i32, i32
  }
  func.func @transform_3(%arg0: i32, %arg1: i32, %arg2: i32) -> (i32, i32) {
    %c0_i32 = arith.constant 0 : i32
    %c0_i32_0 = arith.constant 0 : i32
    return %arg1, %c0_i32 : i32, i32
  }
  func.func @transform_4(%arg0: i32, %arg1: i32, %arg2: i32) -> (i32, i32) {
    %c0_i32 = arith.constant 0 : i32
    return %arg0, %arg1 : i32, i32
  }
}

</mosaic_0001>

<bundles_post_ra>
// kernel: tpu_custom_call.1
= control target key start
LH: loop header
LB: loop body
LE: loop exit
PB: predicated region body
PF: predicated region fallthrough
CT: control target
= control target key end

     0   :  { %v358_v2 = vmov 0   ;;  %s510_s0 = inlined_call_operand.vmem [shape: f32[8,128], index: 0, kind: input, shape index: {}]   ;;  %s511_s1 = inlined_call_operand.vmem [shape: f32[8,1], index: 1, kind: input, shape index: {}]   ;;  %s512_s2 = inlined_call_operand.vmem [shape: f32[128,128], index: 2, kind: input, shape index: {}]   ;;  %s513_s3 = inlined_call_operand.vmem [shape: f32[128,1], index: 3, kind: input, shape index: {}]   ;;  %s514_s4 = inlined_call_operand.hbm [shape: f32[8,128], index: 4, kind: output, shape index: {}]  }
   0x1   :  { %v49_v0 = vld [vmem:[%s513_s3 + $0x10] sm:$0xff]  ;;  %v47_v1 = vld [vmem:[%s513_s3] sm:$0xff]  ;;  %333 = vset.pattern.permute.xlu1 %v358_v2  ;;  %332 = vset.pattern.permute.xlu0 %v358_v2  ;;  %v50_v3 = vld [vmem:[%s513_s3 + $0x18] sm:$0xff] }
   0x2   :  { %75 = vperm.xlu1 %333, %v49_v0   ;;  %65 = vperm.xlu0 %332, %v47_v1   ;;  %v48_v4 = vld [vmem:[%s513_s3 + $0x8] sm:$0xff]  ;;  %v51_v6 = vld [vmem:[%s513_s3 + $0x20] sm:$0xff] }
   0x3   :  { %v52_v5 = vld [vmem:[%s513_s3 + $0x28] sm:$0xff] }
   0x6   :  { %80 = vperm.xlu1 %333, %v50_v3   ;;  %70 = vperm.xlu0 %332, %v48_v4  }
   0x7   :  { %9 = vsyncpa [#allocation4], 0  ;;  %v359_v7 = vmov 0.0|0.0   ;;  %v54_v8 = vld [vmem:[%s513_s3 + $0x38] sm:$0xff]  ;;  %v53_v9 = vld [vmem:[%s513_s3 + $0x30] sm:$0xff]  ;;  %vm360_vm0 = vmmov 0  }
   0x8   :  { %303 = vmatprep.subr.bf16.mxu0 %v359_v7  ;;  %v56_v10 = vld [vmem:[%s513_s3 + $0x48] sm:$0xff]  ;;  %v55_v11 = vld [vmem:[%s513_s3 + $0x40] sm:$0xff]  ;;  %v58_v12 = vld [vmem:[%s513_s3 + $0x58] sm:$0xff]  ;;  %v361_v19 = vmov 0.0   ;;  %s362_s27 = smov [#allocation3]  }
   0x9   :  { %v57_v13 = vld [vmem:[%s513_s3 + $0x50] sm:$0xff]  ;;  %v60_v14 = vld [vmem:[%s513_s3 + $0x68] sm:$0xff]  ;;  %v59_v15 = vld [vmem:[%s513_s3 + $0x60] sm:$0xff]  ;;  %300 = vmatprep.mubr.msk.f32.mxu0 %vm360_vm0, %v361_v19  ;;  %s243_s28 = sshll.u32 %s362_s27, 4  ;;  %s244_s28 = int_to_ptr.vmem [resolvable:$true] %s243_s28 }
   0xa   :  { %90 = vperm.xlu1 %333, %v52_v5   ;;  %85 = vperm.xlu0 %332, %v51_v6   ;;  %v62_v16 = vld [vmem:[%s513_s3 + $0x78] sm:$0xff]  ;;  %v61_v17 = vld [vmem:[%s513_s3 + $0x70] sm:$0xff]  ;;  %v24_v18 = vld [vmem:[%s511_s1] sm:$0xff]  ;;  %p339_p1 = scmp.lt.s32.totalorder %s244_s28, %s244_s28 }
   0xb   :  { %v31_v21 = vld [vmem:[%s512_s2] sm:$0xff]  ;;  %v32_v22 = vld [vmem:[%s512_s2 + $0x8] sm:$0xff]  ;;  %v33_v28 = vld [vmem:[%s512_s2 + $0x10] sm:$0xff] }
   0xc   :  { %v34_v29 = vld [vmem:[%s512_s2 + $0x18] sm:$0xff]  ;;  %v36_v34 = vld [vmem:[%s512_s2 + $0x28] sm:$0xff]  ;;  %v35_v36 = vld [vmem:[%s512_s2 + $0x20] sm:$0xff] }
   0xd   :  { %v38_v41 = vld [vmem:[%s512_s2 + $0x38] sm:$0xff]  ;;  %v37_v43 = vld [vmem:[%s512_s2 + $0x30] sm:$0xff]  ;;  %v40_v48 = vld [vmem:[%s512_s2 + $0x48] sm:$0xff] }
   0xe   :  { %100 = vperm.xlu1 %333, %v54_v8   ;;  %95 = vperm.xlu0 %332, %v53_v9   ;;  %v39_v50 = vld [vmem:[%s512_s2 + $0x40] sm:$0xff]  ;;  %v42_v55 = vld [vmem:[%s512_s2 + $0x58] sm:$0xff]  ;;  %v41_v57 = vld [vmem:[%s512_s2 + $0x50] sm:$0xff] }
   0xf   :  { %v44_v62 = vld [vmem:[%s512_s2 + $0x68] sm:$0xff]  ;;  %v43_v0 = vld [vmem:[%s512_s2 + $0x60] sm:$0xff]  ;;  %v46_v5 = vld [vmem:[%s512_s2 + $0x78] sm:$0xff] }
  0x10   :  { %v45_v8 = vld [vmem:[%s512_s2 + $0x70] sm:$0xff]  ;;  %s334_s2 = scalar_lea.vmem %s244_s28, 128 }
  0x11   :  { %p335_p0 = scmp.ne.s32.totalorder %s244_s28, %s334_s2  ;;  %p340_p2 = scmp.lt.s32.totalorder %s334_s2, %s334_s2 }
  0x12   :  { %110 = vperm.xlu1 %333, %v56_v10   ;;  %105 = vperm.xlu0 %332, %v55_v11  }
  0x13   :  { %p341_p3 = por %p340_p2, %p339_p1 }
  0x15   :  { %p342_p4 = pnand %p341_p3, %p335_p0 }
  0x16   :  { %120 = vperm.xlu1 %333, %v58_v12   ;;  %115 = vperm.xlu0 %332, %v57_v13  }
  0x1a   :  { %130 = vperm.xlu1 %333, %v60_v14   ;;  %125 = vperm.xlu0 %332, %v59_v15   ;;  %v23_v14 = vld [vmem:[%s510_s0] sm:$0xff] }
  0x1e   :  { %140 = vperm.xlu1 %333, %v62_v16   ;;  %135 = vperm.xlu0 %332, %v61_v17  }
  0x22   :  { %27 = vperm.xlu0 %332, %v24_v18  }
  0x81   :  { %v66_v20 = vpop.permute.xlu0 %65  ;;  %v76_v23 = vpop.permute.xlu1 %75 }
  0x82   :  { %v143_v25 = vmul.f32 %v66_v20, %v31_v21  ;;  %v145_v31 = vmul.f32 %v76_v23, %v33_v28 }
  0x85   :  { %v71_v24 = vpop.permute.xlu0 %70  ;;  %v81_v30 = vpop.permute.xlu1 %80 }
  0x86   :  { %v144_v26 = vmul.f32 %v71_v24, %v32_v22  ;;  %v146_v32 = vmul.f32 %v81_v30, %v34_v29 }
  0x88   :  { %v304_v27 = vpack.c.bf16 %v144_v26, %v143_v25  ;;  %v307_v33 = vpack.c.bf16 %v146_v32, %v145_v31 }
  0x89   :  { %v91_v35 = vpop.permute.xlu1 %90  ;;  %v86_v37 = vpop.permute.xlu0 %85 }
  0x8a   :  { %305 = vmatpush3.bf16.xpose.msra.mxu0 %v304_v27  ;;  %v148_v38 = vmul.f32 %v91_v35, %v36_v34  ;;  %v147_v39 = vmul.f32 %v86_v37, %v35_v36 }
  0x8b   :  { %306 = vmatprep.subr.bf16.mxu0 %v359_v7 }
  0x8c   :  { %v310_v40 = vpack.c.bf16 %v148_v38, %v147_v39 }
  0x8d   :  { %v101_v42 = vpop.permute.xlu1 %100  ;;  %v96_v44 = vpop.permute.xlu0 %95 }
  0x8e   :  { %v150_v45 = vmul.f32 %v101_v42, %v38_v41  ;;  %v149_v46 = vmul.f32 %v96_v44, %v37_v43 }
  0x90   :  { %v313_v47 = vpack.c.bf16 %v150_v45, %v149_v46 }
  0x91   :  { %v111_v49 = vpop.permute.xlu1 %110  ;;  %v106_v51 = vpop.permute.xlu0 %105 }
  0x92   :  { %308 = vmatpush3.bf16.xpose.msra.mxu0 %v307_v33  ;;  %v152_v52 = vmul.f32 %v111_v49, %v40_v48  ;;  %v151_v53 = vmul.f32 %v106_v51, %v39_v50 }
  0x93   :  { %309 = vmatprep.subr.bf16.mxu0 %v359_v7 }
  0x94   :  { %v316_v54 = vpack.c.bf16 %v152_v52, %v151_v53 }
  0x95   :  { %v121_v56 = vpop.permute.xlu1 %120  ;;  %v116_v58 = vpop.permute.xlu0 %115 }
  0x96   :  { %v154_v59 = vmul.f32 %v121_v56, %v42_v55  ;;  %v153_v60 = vmul.f32 %v116_v58, %v41_v57 }
  0x98   :  { %v319_v61 = vpack.c.bf16 %v154_v59, %v153_v60 }
  0x99   :  { %v131_v63 = vpop.permute.xlu1 %130  ;;  %v126_v1 = vpop.permute.xlu0 %125 }
  0x9a   :  { %311 = vmatpush3.bf16.xpose.msra.mxu0 %v310_v40  ;;  %v156_v2 = vmul.f32 %v131_v63, %v44_v62  ;;  %v155_v3 = vmul.f32 %v126_v1, %v43_v0 }
  0x9b   :  { %312 = vmatprep.subr.bf16.mxu0 %v359_v7 }
  0x9c   :  { %v322_v4 = vpack.c.bf16 %v156_v2, %v155_v3 }
  0x9d   :  { %v141_v6 = vpop.permute.xlu1 %140  ;;  %v136_v9 = vpop.permute.xlu0 %135 }
  0x9e   :  { %v158_v10 = vmul.f32 %v141_v6, %v46_v5  ;;  %v157_v11 = vmul.f32 %v136_v9, %v45_v8 }
  0xa0   :  { %v325_v12 = vpack.c.bf16 %v158_v10, %v157_v11 }
  0xa1   :  { %v28_v13 = vpop.permute.xlu0 %27 }
  0xa2   :  { %314 = vmatpush3.bf16.xpose.msra.mxu0 %v313_v47  ;;  %v30_v15 = vmul.f32 %v28_v13, %v23_v14 }
  0xa3   :  { %315 = vmatprep.subr.bf16.mxu0 %v359_v7 }
  0xaa   :  { %317 = vmatpush3.bf16.xpose.msra.mxu0 %v316_v54 }
  0xab   :  { %318 = vmatprep.subr.bf16.mxu0 %v359_v7 }
  0xb2   :  { %320 = vmatpush3.bf16.xpose.msra.mxu0 %v319_v61 }
  0xb3   :  { %321 = vmatprep.subr.bf16.mxu0 %v359_v7 }
  0xba   :  { %323 = vmatpush3.bf16.xpose.msra.mxu0 %v322_v4 }
  0xbb   :  { %324 = vmatprep.subr.bf16.mxu0 %v359_v7 }
  0xc2   :  { %326 = vmatpush3.bf16.xpose.msra.mxu0 %v325_v12 }
  0xc9   :  { %301 = vmatmul.mubr.f32.vlgmr.msra.gmra.mrb[0].mxu0 %v30_v15 }
 0x19c   :  { %v226_v16 = vpop.f32.mrb[0].mxu0 }
 0x19d   :  { %236 = vst [vmem:[#allocation3] sm:$0xff] %v226_v16  ;;  %v302_v17 = vpop.f32.mrb[1].mxu0 }
 0x19e   :  { %345 = shalt.err (!%p342_p4)
}
 0x19f   :  { %s346_s5 = scalar_lea.hbm %s514_s4, 128 }
 0x1a0   :  { %p347_p5 = scmp.ne.s32.totalorder %s514_s4, %s346_s5  ;;  %p350_p6 = scmp.lt.u32.totalorder %s346_s5, %s514_s4 }
 0x1a2   :  { %p352_p7 = pnand %p350_p6, %p347_p5 }
 0x1a4   :  { %355 = shalt.err (!%p352_p7)
}
 0x1a5   :  { %246 = dma.vmem_to_hbm [thread:$0]  %s244_s28, 128, %s514_s4, [#allocation4]  }
 0x1a6   :  { %356 = dma.done.wait [#allocation4], 128  }
 0x1a7   :  { %357 = vsyncadd [#allocation4], 4294967168 }
 0x1a8   :  { %250 = vsyncpa [#allocation4], 1 }

</bundles_post_ra>
